<compile_context>
chip_gen: v7x
topology: tpu7x:2x2x1
jax: 0.10.0
libtpu: 0.0.40
codegen_flags: <defaults>
</compile_context>

<pallas_src>
import math

import numpy as np
import jax
import jax.numpy as jnp
from jax import lax
from jax.experimental import pallas as pl
from jax.experimental.pallas import tpu as pltpu

EPS = 1e-5                                              # torch GroupNorm default eps
TAPS = tuple((dh, dw) for dh in (-1, 0, 1) for dw in (-1, 0, 1))
WLANES = 64                                             # lanes of packed weight buffer (>= max Cin)


def _rup(v, m):
    return (v + m - 1) // m * m


# ------------------------------ network layout ------------------------------ #

def build_layout(in_channels=2, out_channels=1, base_features=4):
    """Static description of every conv: packed-buffer offsets + channel meta.
    Shared by the packer and the kernel builder so offsets can never diverge."""
    bf = base_features
    cin_pad = _rup(in_channels, 8)                      # kernel-side input channels (zero-padded)
    convs, wrow, prow = [], 0, 0

    def add(name, cins, cout, gn, ksize=3, cin_real=None):
        nonlocal wrow, prow
        tap_rows = _rup(cout, 8)                        # sublane-aligned per-tap row block
        convs.append(dict(
            name=name, cins=tuple(cins), cout=cout, gn=gn, ksize=ksize,
            cin_real=(cin_real if cin_real is not None else sum(cins)),
            tap_rows=tap_rows, woff=wrow, poff=prow))
        wrow += tap_rows * (9 if ksize == 3 else 1)
        prow += tap_rows

    prev = cin_pad
    for i, c in enumerate([bf, bf * 2, bf * 4, bf * 8], start=1):
        add(f'enc{i}.c1', (prev,), c, True,
            cin_real=(in_channels if i == 1 else prev))
        add(f'enc{i}.c2', (c,), c, True)
        prev = c
    add('bottleneck.c1', (prev,), bf * 16, True)
    add('bottleneck.c2', (bf * 16,), bf * 16, True)
    prev = bf * 16
    for lvl, c in ((4, bf * 8), (3, bf * 4), (2, bf * 2), (1, bf)):
        add(f'up{lvl}', (prev,), c, False)
        add(f'dec{lvl}.c1', (c, c), c, True)            # (upconv out, encoder skip)
        add(f'dec{lvl}.c2', (c,), c, True)
        prev = c
    add('outconv', (bf,), out_channels, False, ksize=1)

    assert max(sum(d['cins']) for d in convs) <= WLANES
    return dict(convs=convs, wrows=wrow, prows=prow, cin_pad=cin_pad,
                in_channels=in_channels, out_channels=out_channels)


# --------------------------- parameter construction ------------------------- #

def init_params(key, layout):
    """Per-conv parameters in PyTorch layout (OIHW), PyTorch default init."""
    params = {}
    for d in layout['convs']:
        cout, cin, k = d['cout'], d['cin_real'], d['ksize']
        key, wk, bk = jax.random.split(key, 3)
        bound = 1.0 / math.sqrt(cin * k * k)
        p = dict(
            w=jax.random.uniform(wk, (cout, cin, k, k), jnp.float32, -bound, bound),
            b=jax.random.uniform(bk, (cout,), jnp.float32, -bound, bound))
        if d['gn']:
            p['gamma'] = jnp.ones((cout,), jnp.float32)
            p['beta'] = jnp.zeros((cout,), jnp.float32)
        params[d['name']] = p
    return params


def pack_params(layout, params):
    """Pack every weight/bias/GN parameter into two contiguous f32 buffers
    (2 DMAs instead of ~46 tiny ones).
      wbuf[woff + t*tap_rows + co, ci] = W[co, ci, dh+1, dw+1]  for tap t=(dh,dw)
      pbuf[poff + co, 0:3]             = (bias, gamma, beta)
    """
    wbuf = np.zeros((layout['wrows'], WLANES), np.float32)
    pbuf = np.zeros((layout['prows'], 4), np.float32)
    for d in layout['convs']:
        p = params[d['name']]
        w = np.asarray(p['w'])
        cout, cin = w.shape[0], w.shape[1]
        taps = TAPS if d['ksize'] == 3 else ((0, 0),)
        for t, (dh, dw) in enumerate(taps):
            r0 = d['woff'] + t * d['tap_rows']
            if d['ksize'] == 3:
                wbuf[r0:r0 + cout, :cin] = w[:, :, dh + 1, dw + 1]
            else:
                wbuf[r0:r0 + cout, :cin] = w[:, :, 0, 0]
        pbuf[d['poff']:d['poff'] + cout, 0] = np.asarray(p['b'])
        if d['gn']:
            pbuf[d['poff']:d['poff'] + cout, 1] = np.asarray(p['gamma'])
            pbuf[d['poff']:d['poff'] + cout, 2] = np.asarray(p['beta'])
    return jnp.asarray(wbuf), jnp.asarray(pbuf)


def tap_masks(H, W):
    """(9, H*W) f32 0/1 masks: tap (dh,dw) is valid where the shifted pixel is
    inside the image (computed on host; no in-kernel iota / div / mod)."""
    hh, ww = np.meshgrid(np.arange(H), np.arange(W), indexing='ij')
    m = np.zeros((9, H * W), np.float32)
    for t, (dh, dw) in enumerate(TAPS):
        valid = (hh + dh >= 0) & (hh + dh < H) & (ww + dw >= 0) & (ww + dw < W)
        m[t] = valid.reshape(-1).astype(np.float32)
    return jnp.asarray(m)


# ----------------------- pltpu.roll convention (probe) ---------------------- #

_ROLL_LIKE_JNP = None


def _roll_like_jnp():
    """pltpu.roll is documented to follow jnp.roll (result[i] = x[i - shift]).
    Probe once at setup so the tap shift signs stay correct under either
    rotate convention."""
    global _ROLL_LIKE_JNP
    if _ROLL_LIKE_JNP is None:
        x = jnp.arange(8 * 128, dtype=jnp.float32).reshape(8, 128)

        def k(x_ref, o_ref):
            o_ref[...] = pltpu.roll(x_ref[...], 1, 1)

        y = pl.pallas_call(k, out_shape=jax.ShapeDtypeStruct((8, 128), jnp.float32))(x)
        _ROLL_LIKE_JNP = bool(jnp.all(y == jnp.roll(x, 1, axis=1)))
    return _ROLL_LIKE_JNP


# -------------------------------- fused kernel ------------------------------ #

def make_kernel(layout, H, W, num_groups, roll_like_jnp):
    HW = H * W
    by_name = {d['name']: d for d in layout['convs']}

    def kernel(x_ref, w_ref, p_ref, m_ref, o_ref):
        # hoisted per-tap edge masks: 8 tiny (1,HW) loads reused by all convs
        masks = {}
        for t, (dh, dw) in enumerate(TAPS):
            if (dh, dw) != (0, 0):
                masks[(dh, dw)] = m_ref[t:t + 1, :]

        def tap(x, dh, dw):
            # tap[c, p] = x[c, p + dh*W + dw] (zero outside the image):
            # one XLU lane rotation + one VPU multiply, no lane concats/copies.
            if (dh, dw) == (0, 0):
                return x
            s = dh * W + dw
            shift = (-s) % HW if roll_like_jnp else s % HW
            return pltpu.roll(x, shift, 1) * masks[(dh, dw)]

        def group_norm_relu(x, gamma, beta, cout):
            # two-pass GroupNorm (mean, then centered variance) -> numerically safe.
            assert cout % num_groups == 0
            cg = cout // num_groups
            inv_n = 1.0 / float(cg * HW)
            parts = []
            for g in range(num_groups):
                s = jnp.sum(x[g * cg:(g + 1) * cg, :], axis=1, keepdims=True)
                s = jnp.sum(s, axis=0, keepdims=True) * inv_n        # (1,1) group mean
                parts.append(jnp.broadcast_to(s, (cg, 1)))
            mean = jnp.concatenate(parts, axis=0)                    # (cout,1)
            xc = x - mean
            parts = []
            for g in range(num_groups):
                xg = xc[g * cg:(g + 1) * cg, :]
                s = jnp.sum(xg * xg, axis=1, keepdims=True)
                s = jnp.sum(s, axis=0, keepdims=True) * inv_n        # (1,1) group var
                parts.append(jnp.broadcast_to(lax.rsqrt(s + EPS), (cg, 1)))
            inv = jnp.concatenate(parts, axis=0)                     # (cout,1)
            return jnp.maximum(xc * inv * gamma + beta, 0.0)

        def conv(name, inputs):
            # 3x3 (or 1x1) conv as per-tap (Cout,Cin)@(Cin,HW) MXU dots accumulated
            # in f32.  Multi-input convs contract consecutive lane slices of the
            # packed weight rows -> replaces the decoder skip concatenation.
            d = by_name[name]
            cout = d['cout']
            taps = TAPS if d['ksize'] == 3 else ((0, 0),)
            acc = None
            for t, (dh, dw) in enumerate(taps):
                r0 = d['woff'] + t * d['tap_rows']
                lane = 0
                for xin, cin in zip(inputs, d['cins']):
                    xt = tap(xin, dh, dw)
                    wt = w_ref[r0:r0 + cout, lane:lane + cin]        # (cout, cin)
                    prod = jnp.dot(wt, xt, preferred_element_type=jnp.float32)
                    acc = prod if acc is None else acc + prod
                    lane += cin
            prm = p_ref[d['poff']:d['poff'] + cout, :]               # (cout, 4)
            acc = acc + prm[:, 0:1]                                  # bias
            if d['gn']:
                acc = group_norm_relu(acc, prm[:, 1:2], prm[:, 2:3], cout)
            return acc

        def block(name, inputs):
            return conv(name + '.c2', [conv(name + '.c1', inputs)])

        x0 = x_ref[0]                                                # (cin_pad, HW)
        e1 = block('enc1', [x0])
        e2 = block('enc2', [e1])
        e3 = block('enc3', [e2])
        e4 = block('enc4', [e3])
        d = block('bottleneck', [e4])
        for lvl, skip in ((4, e4), (3, e3), (2, e2), (1, e1)):
            u = conv(f'up{lvl}', [d])
            d = block(f'dec{lvl}', [u, skip])
        o_ref[0] = conv('outconv', [d])                              # (Cout, HW) lane-dense

    return kernel


# ------------------------------- public wrapper ------------------------------ #

def basicnetwork_forward(x_nchw, wbuf, pbuf, layout, num_groups=4):
    N, Cin, H, W = x_nchw.shape
    HW = H * W
    cin_pad = layout['cin_pad']
    cout = layout['out_channels']
    assert Cin == layout['in_channels']

    # NCHW -> (N, C, H*W): channels on sublanes, pixels lane-dense (free reshape).
    x = x_nchw.reshape(N, Cin, HW)
    if cin_pad > Cin:
        x = jnp.pad(x, ((0, 0), (0, cin_pad - Cin), (0, 0)))

    masks = tap_masks(H, W)
    kernel = make_kernel(layout, H, W, num_groups, _roll_like_jnp())

    out = pl.pallas_call(
        kernel,
        out_shape=jax.ShapeDtypeStruct((N, cout, HW), jnp.float32),
        grid=(N,),
        in_specs=[
            pl.BlockSpec((1, cin_pad, HW), lambda n: (n, 0, 0)),
            # constant index maps: weights / params / masks are DMA'd once and
            # stay VMEM-resident across the whole batch grid.
            pl.BlockSpec(wbuf.shape, lambda n: (0, 0)),
            pl.BlockSpec(pbuf.shape, lambda n: (0, 0)),
            pl.BlockSpec(masks.shape, lambda n: (0, 0)),
        ],
        out_specs=pl.BlockSpec((1, cout, HW), lambda n: (n, 0, 0)),
        compiler_params=pltpu.CompilerParams(
            dimension_semantics=("parallel",),          # v7x: one image per TensorCore
            vmem_limit_bytes=32 * 1024 * 1024),
    )(x, wbuf, pbuf, masks)

    return out.reshape(N, cout, H, W)                   # NCHW, free reshape


# ------------------------- pure-JAX reference (check) ------------------------ #

def reference_forward(x, params, num_groups=4):
    """Pure-JAX forward of the same effective graph (validation only)."""
    def conv(x, p, pad):
        y = lax.conv_general_dilated(
            x, p['w'], window_strides=(1, 1), padding=((pad, pad), (pad, pad)),
            dimension_numbers=('NCHW', 'OIHW', 'NCHW'),
            precision=lax.Precision.HIGHEST)
        return y + p['b'][None, :, None, None]

    def gn_relu(x, p):
        n, c, h, w = x.shape
        g = num_groups
        xg = x.reshape(n, g, c // g, h, w)
        m = jnp.mean(xg, axis=(2, 3, 4), keepdims=True)
        v = jnp.mean((xg - m) ** 2, axis=(2, 3, 4), keepdims=True)
        y = ((xg - m) * lax.rsqrt(v + EPS)).reshape(n, c, h, w)
        y = y * p['gamma'][None, :, None, None] + p['beta'][None, :, None, None]
        return jnp.maximum(y, 0.0)

    def block(x, name):
        x = gn_relu(conv(x, params[name + '.c1'], 1), params[name + '.c1'])
        return gn_relu(conv(x, params[name + '.c2'], 1), params[name + '.c2'])

    e1 = block(x, 'enc1')
    e2 = block(e1, 'enc2')
    e3 = block(e2, 'enc3')
    e4 = block(e3, 'enc4')
    d = block(e4, 'bottleneck')
    for lvl, skip in ((4, e4), (3, e3), (2, e2), (1, e1)):
        u = conv(d, params[f'up{lvl}'], 1)
        d = block(jnp.concatenate([u, skip], axis=1), f'dec{lvl}')
    return conv(d, params['outconv'], 0)


# ------------------------------------ main ----------------------------------- #

if __name__ == "__main__":
    key = jax.random.PRNGKey(0)
    pkey, xkey = jax.random.split(key)

    layout = build_layout(in_channels=2, out_channels=1, base_features=4)
    params = init_params(pkey, layout)
    wbuf, pbuf = pack_params(layout, params)

    # small deterministic NCHW input: batch=2, channels=2, spatial=16x16
    x = jax.random.normal(xkey, (2, 2, 16, 16), jnp.float32)

    y = basicnetwork_forward(x, wbuf, pbuf, layout, num_groups=4)
    y = jax.block_until_ready(y)
    assert y.shape == (2, 1, 16, 16), y.shape
    assert bool(jnp.all(jnp.isfinite(y)))

    # validate against the pure-JAX reference of the same effective graph
    y_ref = jax.block_until_ready(reference_forward(x, params, num_groups=4))
    err = float(jnp.max(jnp.abs(y - y_ref)))
    assert err < 2e-2, f"kernel/reference mismatch: max|diff|={err}"

    print("KERNEL_OK")
</pallas_src>

<mosaic_0001>
module attributes {stable_mosaic.version = 11 : i64} {
  func.func @k(%arg0: memref<8x128xf32, #tpu.memory_space<vmem>>, %arg1: memref<8x128xf32, #tpu.memory_space<vmem>>) attributes {dimension_semantics = [], scalar_prefetch = 0 : i64, scratch_operands = 0 : i64, tpu.core_type = #tpu.core_type<tc>} {
    %c0 = arith.constant 0 : index
    %c0_0 = arith.constant 0 : index
    %0 = vector.load %arg0[%c0, %c0_0] : memref<8x128xf32, #tpu.memory_space<vmem>>, vector<8x128xf32>
    %c1_i32 = arith.constant 1 : i32
    %1 = tpu.dynamic_rotate %0 by %c1_i32 dim 1 : vector<8x128xf32>, i32 -> vector<8x128xf32>
    %c0_1 = arith.constant 0 : index
    %c0_2 = arith.constant 0 : index
    %2 = vector.load %arg1[%c0_1, %c0_2] : memref<8x128xf32, #tpu.memory_space<vmem>>, vector<8x128xf32>
    tpu.vector_store %arg1[%c0_1, %c0_2], %1 {strides = array<i32>} : memref<8x128xf32, #tpu.memory_space<vmem>>, vector<8x128xf32>,
    return
  }
}

</mosaic_0001>

<bundles_post_ra>
// kernel: tpu_custom_call.1
= control target key start
LH: loop header
LB: loop body
LE: loop exit
PB: predicated region body
PF: predicated region fallthrough
CT: control target
= control target key end

     0   :  { %6 = vsyncpa [#allocation3], 0  ;;  %s128_s0 = inlined_call_operand.hbm [shape: f32[8,128], index: 0, kind: input, shape index: {}]   ;;  %s129_s1 = inlined_call_operand.hbm [shape: f32[8,128], index: 1, kind: output, shape index: {}]  }
   0x1   :  { %7 = vsyncpa [#allocation4], 0  ;;  %s91_s6 = smov [#allocation2]   ;;  %s43_s10 = scalar_lea.hbm %s128_s0, 128 }
   0x2   :  { %s14_s7 = sshll.u32 %s91_s6, 4  ;;  %p44_p0 = scmp.ne.s32.totalorder %s128_s0, %s43_s10  ;;  %s15_s7 = int_to_ptr.vmem [resolvable:$true] %s14_s7 }
   0x3   :  { %p47_p1 = scmp.lt.u32.totalorder %s43_s10, %s128_s0 }
   0x5   :  { %p49_p2 = pnand %p47_p1, %p44_p0 }
   0x7   :  { %52 = shalt.err (!%p49_p2)
}
   0x8   :  { %s53_s15 = scalar_lea.vmem %s15_s7, 128  ;;  %p58_p4 = scmp.lt.s32.totalorder %s15_s7, %s15_s7 }
   0x9   :  { %p54_p3 = scmp.ne.s32.totalorder %s15_s7, %s53_s15  ;;  %p59_p5 = scmp.lt.s32.totalorder %s53_s15, %s53_s15 }
   0xb   :  { %p60_p6 = por %p59_p5, %p58_p4 }
   0xd   :  { %p61_p7 = pnand %p60_p6, %p54_p3 }
   0xf   :  { %64 = shalt.err (!%p61_p7)
}
  0x10   :  { %17 = dma.hbm_to_vmem [thread:$0]  %s128_s0, 128, %s15_s7, [#allocation3]  }
  0x11   :  { %87 = dma.done.wait [#allocation3], 128  }
  0x12   :  { %88 = vsyncadd [#allocation3], 4294967168  ;;  %v21_v0 = vld [vmem:[#allocation2] sm:$0xff]  ;;  %s92_s18 = smov 1   ;;  %s93_s19 = smov [#allocation5]  }
  0x13   :  { %22 = vrot.lane.b32.xlu0 %v21_v0, %s92_s18  ;;  %s31_s20 = sshll.u32 %s93_s19, 4  ;;  %s32_s20 = int_to_ptr.vmem [resolvable:$true] %s31_s20 }
  0x14   :  { %s65_s21 = scalar_lea.vmem %s32_s20, 128  ;;  %p70_p9 = scmp.lt.s32.totalorder %s32_s20, %s32_s20 }
  0x15   :  { %p66_p8 = scmp.ne.s32.totalorder %s32_s20, %s65_s21  ;;  %p71_p10 = scmp.lt.s32.totalorder %s65_s21, %s65_s21 }
  0x17   :  { %p72_p11 = por %p71_p10, %p70_p9 }
  0x19   :  { %p73_p12 = pnand %p72_p11, %p66_p8 }
  0x85   :  { %v23_v1 = vpop.permute.xlu0 %22 }
  0x86   :  { %24 = vst [vmem:[#allocation5] sm:$0xff] %v23_v1 }
  0x87   :  { %76 = shalt.err (!%p73_p12)
}
  0x88   :  { %s77_s0 = scalar_lea.hbm %s129_s1, 128 }
  0x89   :  { %p78_p13 = scmp.ne.s32.totalorder %s129_s1, %s77_s0  ;;  %p81_p0 = scmp.lt.u32.totalorder %s77_s0, %s129_s1 }
  0x8b   :  { %p83_p1 = pnand %p81_p0, %p78_p13 }
  0x8d   :  { %86 = shalt.err (!%p83_p1)
}
  0x8e   :  { %34 = dma.vmem_to_hbm [thread:$0]  %s32_s20, 128, %s129_s1, [#allocation4]  }
  0x8f   :  { %89 = dma.done.wait [#allocation4], 128  }
  0x90   :  { %90 = vsyncadd [#allocation4], 4294967168 }
  0x91   :  { %38 = vsyncpa [#allocation3], 1 }
  0x92   :  { %39 = vsyncpa [#allocation4], 1 }

</bundles_post_ra>
